<compile_context>
chip_gen: v6e
topology: v6e:2x2x1
jax: 0.10.0
libtpu: 0.0.40
codegen_flags: <defaults>
</compile_context>

<pallas_src>
import functools

import jax
import jax.numpy as jnp
from jax.experimental import pallas as pl
from jax.experimental.pallas import tpu as pltpu


def _patch_embed_kernel(pd_ref, pf_ref, w1_ref, w2_ref, b_ref, out_ref):
    # Two accumulating MXU matmuls (f32 accumulation) + one broadcast bias add.
    acc = jnp.dot(pd_ref[...], w1_ref[...], preferred_element_type=jnp.float32)
    acc = acc + jnp.dot(pf_ref[...], w2_ref[...], preferred_element_type=jnp.float32)
    out_ref[...] = (acc + b_ref[...]).astype(out_ref.dtype)


def _round_up(x, m):
    return ((x + m - 1) // m) * m


def _extract_patches(x, ph, pw, dtype):
    """(B,T,C,H,W) -> (B*T*N, C*ph*pw) in compute dtype; patch flattened (C,kh,kw)."""
    B, T, C, H, W = x.shape
    nh, nw = H // ph, W // pw
    x = x.reshape(B, T, C, nh, ph, nw, pw)
    # token order = (h_patch, w_patch) row-major, matching conv .flatten(2).transpose(1,2)
    x = jnp.transpose(x, (0, 1, 3, 5, 2, 4, 6))
    # Cast fused into the im2col copy -> the (M, K) HBM intermediate is already bf16.
    return x.reshape(B * T * nh * nw, C * ph * pw).astype(dtype)


def _tpu_vmem_bytes():
    try:
        return int(pltpu.get_tpu_info().vmem_capacity_bytes)
    except Exception:
        return 128 << 20  # v5e/v6e physical VMEM; conservative default


def _num_tensorcores(phys_vmem):
    """v7x has 2 TensorCores per chip (64 MiB VMEM per TC); v5e/v6e have 1."""
    try:
        kind = jax.devices()[0].device_kind.lower()
        if "v7" in kind or "7x" in kind:
            return 2
    except Exception:
        pass
    return 2 if phys_vmem <= (64 << 20) else 1


def _choose_tiles(M, Kd, Kf, E, in_bytes, out_bytes):
    """Returns (TM, TE, n_j, weight_bufs, vmem_limit). Padded E = TE * n_j >= E."""
    phys = _tpu_vmem_bytes()
    n_tc = _num_tensorcores(phys)
    vmem_limit = int(min(phys * 3 // 4, 96 << 20))   # raise scoped limit explicitly
    budget = vmem_limit - (4 << 20)                  # headroom for Mosaic internals

    K = Kd + Kf
    Ep0 = _round_up(max(E, 1), 128)                  # lane-dense output / MXU columns
    w_col_bytes = K * in_bytes + 4                   # one E-column of [W1;W2] + f32 bias

    big_weight = K * Ep0 * in_bytes > (2 << 20)
    wbuf = 1 if big_weight else 2
    if w_col_bytes * Ep0 * wbuf <= budget // 3:
        # Weight fits resident; single-buffer it only when that actually saves VMEM.
        TE, n_j = Ep0, 1
        weight_bufs = 1 if big_weight else None      # None -> default pipelining
    else:
        # Tile E (extra grid axis) instead of shrinking TM (TM buys HBM bandwidth).
        te_max = max(128, ((budget // 3) // (w_col_bytes * 2)) // 128 * 128)
        n_j = -(-Ep0 // te_max)
        TE = _round_up(-(-Ep0 // n_j), 128)
        weight_bufs = None                           # streamed over j -> double-buffered
        wbuf = 2
    w_bytes = w_col_bytes * TE * wbuf

    # Row tile: biggest multiple of 16 that fits (bf16 sublane packing), capped at
    # 1024 (>=512 rows already hit ~85% of the HBM roofline).
    per_row = 2 * K * in_bytes + 2 * TE * out_bytes  # double-buffered in + out tiles
    TM = max(16, min(1024, max(0, budget - w_bytes) // per_row) // 16 * 16)
    if TM >= M:
        TM = _round_up(M, 16)
        if n_tc > 1 and M > 16:                      # give both v7x TensorCores work
            TM = _round_up(-(-M // 2), 16)
    return TM, TE, n_j, weight_bufs, vmem_limit


@functools.partial(jax.jit,
                   static_argnames=("patch_size", "compute_dtype", "out_dtype"))
def patch_embed_forward(data, forcing, params, patch_size,
                        compute_dtype=jnp.bfloat16, out_dtype=None):
    """data: (B,T,Cd,H,W), forcing: (B,T,Cf,H,W) -> (B,T,N,E)."""
    ph, pw = patch_size
    B, T, Cd, H, W = data.shape
    Cf = forcing.shape[2]
    nh, nw = H // ph, W // pw
    N = nh * nw

    wd, bd = params["data_w"], params["data_b"]      # (E/2, Cd, ph, pw), (E/2,)
    wf, bf = params["forc_w"], params["forc_b"]      # (E/2, Cf, ph, pw), (E/2,)
    wfus, bfus = params["fus_w"], params["fus_b"]    # (E, E), (E,)
    Eh = wd.shape[0]
    E = wfus.shape[0]
    Kd = Cd * ph * pw
    Kf = Cf * ph * pw

    out_dtype = data.dtype if out_dtype is None else out_dtype
    in_bytes = jnp.dtype(compute_dtype).itemsize
    out_bytes = jnp.dtype(out_dtype).itemsize

    M = B * T * N
    TM, TE, n_j, weight_bufs, vmem_limit = _choose_tiles(
        M, Kd, Kf, E, in_bytes, out_bytes)
    Ep = TE * n_j                                    # lane-dense padded embed dim

    # --- One-time algebraic fold (tiny, f32): convs-as-matmul + fusion Linear
    #     collapse into two projections (one per input stream) and one bias. ---
    wd_t = wd.reshape(Eh, Kd).T                      # (Kd, E/2)
    wf_t = wf.reshape(Eh, Kf).T                      # (Kf, E/2)
    wfus1_t = wfus[:, :Eh].T                         # (E/2, E)
    wfus2_t = wfus[:, Eh:].T                         # (E/2, E)
    w1 = jnp.pad(wd_t @ wfus1_t, ((0, 0), (0, Ep - E))).astype(compute_dtype)  # (Kd, Ep)
    w2 = jnp.pad(wf_t @ wfus2_t, ((0, 0), (0, Ep - E))).astype(compute_dtype)  # (Kf, Ep)
    b_fold = (bd @ wfus1_t + bf @ wfus2_t + bfus).reshape(1, E)
    b_fold = jnp.pad(b_fold, ((0, 0), (0, Ep - E))).astype(jnp.float32)        # (1, Ep)

    # --- Patch extraction in XLA (transpose+cast fuse into one bf16 im2col pass).
    pd = _extract_patches(data, ph, pw, compute_dtype)      # (M, Kd)
    pf = _extract_patches(forcing, ph, pw, compute_dtype)   # (M, Kf)
    M_pad = _round_up(M, TM)
    if M_pad != M:                                   # ragged M handled by row padding
        pd = jnp.pad(pd, ((0, M_pad - M), (0, 0)))
        pf = jnp.pad(pf, ((0, M_pad - M), (0, 0)))

    # Constant-index weight/bias blocks: single-buffer only when large (saves VMEM);
    # otherwise leave the default pipelining.
    w_mode = {} if weight_bufs is None else {"pipeline_mode": pl.Buffered(weight_bufs)}

    grid = (M_pad // TM, n_j)
    out = pl.pallas_call(
        _patch_embed_kernel,
        out_shape=jax.ShapeDtypeStruct((M_pad, Ep), out_dtype),
        grid_spec=pltpu.PrefetchScalarGridSpec(
            num_scalar_prefetch=0,
            grid=grid,
            in_specs=[
                pl.BlockSpec((TM, Kd), lambda i, j: (i, 0)),          # streamed rows
                pl.BlockSpec((TM, Kf), lambda i, j: (i, 0)),          # streamed rows
                pl.BlockSpec((Kd, TE), lambda i, j: (0, j), **w_mode),  # folded W1
                pl.BlockSpec((Kf, TE), lambda i, j: (0, j), **w_mode),  # folded W2
                pl.BlockSpec((1, TE), lambda i, j: (0, j), **w_mode),   # folded bias
            ],
            out_specs=pl.BlockSpec((TM, TE), lambda i, j: (i, j)),
        ),
        compiler_params=pltpu.CompilerParams(
            dimension_semantics=("parallel", "parallel"),
            vmem_limit_bytes=vmem_limit),
    )(pd, pf, w1, w2, b_fold)

    return out[:M, :E].reshape(B, T, N, E)


def init_params(key, data_channels, forcing_channels, embed_dim, patch_size):
    ph, pw = patch_size
    eh = embed_dim // 2
    ks = jax.random.split(key, 6)
    return {
        "data_w": jax.random.normal(ks[0], (eh, data_channels, ph, pw), jnp.float32) * 0.05,
        "data_b": jax.random.normal(ks[1], (eh,), jnp.float32) * 0.05,
        "forc_w": jax.random.normal(ks[2], (eh, forcing_channels, ph, pw), jnp.float32) * 0.05,
        "forc_b": jax.random.normal(ks[3], (eh,), jnp.float32) * 0.05,
        "fus_w": jax.random.normal(ks[4], (embed_dim, embed_dim), jnp.float32) * 0.05,
        "fus_b": jax.random.normal(ks[5], (embed_dim,), jnp.float32) * 0.05,
    }


def _reference_forward(data, forcing, params, patch_size):
    """Pure-JAX reference using lax.conv_general_dilated, mirrors the PyTorch module."""
    ph, pw = patch_size
    B, T, Cd, H, W = data.shape
    E = params["fus_w"].shape[0]
    Eh = E // 2

    def conv(x, w, b):
        y = jax.lax.conv_general_dilated(
            x, w, window_strides=(ph, pw), padding="VALID",
            dimension_numbers=("NCHW", "OIHW", "NCHW"))
        return y + b.reshape(1, -1, 1, 1)

    outs = []
    for t in range(T):
        de = conv(data[:, t], params["data_w"], params["data_b"])
        fe = conv(forcing[:, t], params["forc_w"], params["forc_b"])
        de = de.reshape(B, Eh, -1).transpose(0, 2, 1)
        fe = fe.reshape(B, Eh, -1).transpose(0, 2, 1)
        comb = jnp.concatenate([de, fe], axis=2)
        comb = comb @ params["fus_w"].T + params["fus_b"]
        outs.append(comb)
    return jnp.stack(outs, axis=1)


if __name__ == "__main__":
    key = jax.random.PRNGKey(0)
    k_data, k_forc, k_param = jax.random.split(key, 3)

    B, T = 2, 2
    H, W = 16, 16
    patch_size = (4, 4)
    data_channels, forcing_channels = 4, 3
    embed_dim = 32

    data = jax.random.normal(k_data, (B, T, data_channels, H, W), jnp.float32)
    forcing = jax.random.normal(k_forc, (B, T, forcing_channels, H, W), jnp.float32)
    params = init_params(k_param, data_channels, forcing_channels, embed_dim, patch_size)

    ref = _reference_forward(data, forcing, params, patch_size)

    # f32 streaming path: validates exact semantics of the folded two-dot kernel.
    out_f32 = patch_embed_forward(data, forcing, params, patch_size,
                                  compute_dtype=jnp.float32)
    out_f32 = jax.block_until_ready(out_f32)
    assert out_f32.shape == (B, T, (H // 4) * (W // 4), embed_dim), out_f32.shape
    assert jnp.allclose(out_f32, ref, atol=1e-4, rtol=1e-4), "f32 path mismatch vs reference"

    # bf16 streaming path (default / fast): looser tolerance for bf16 input rounding.
    out = patch_embed_forward(data, forcing, params, patch_size)
    out = jax.block_until_ready(out)
    assert out.shape == (B, T, (H // 4) * (W // 4), embed_dim), out.shape
    assert jnp.allclose(out, ref, atol=2e-2, rtol=2e-2), "bf16 path mismatch vs reference"

    print("KERNEL_OK")
</pallas_src>

<mosaic_0001>
module attributes {stable_mosaic.version = 11 : i64} {
  func.func @_patch_embed_kernel(%arg0: i32, %arg1: i32, %arg2: memref<64x64xf32, #tpu.memory_space<vmem>>, %arg3: memref<64x48xf32, #tpu.memory_space<vmem>>, %arg4: memref<64x128xf32, #tpu.memory_space<vmem>>, %arg5: memref<48x128xf32, #tpu.memory_space<vmem>>, %arg6: memref<1x128xf32, #tpu.memory_space<vmem>>, %arg7: memref<64x128xf32, #tpu.memory_space<vmem>>) attributes {dimension_semantics = [#tpu.dimension_semantics<parallel>, #tpu.dimension_semantics<parallel>], iteration_bounds = array<i64: 1, 1>, scalar_prefetch = 0 : i64, scratch_operands = 0 : i64, tpu.core_type = #tpu.core_type<tc>, window_params = [{transform_indices = @transform_0, window_bounds = array<i64: 64, 64>}, {transform_indices = @transform_1, window_bounds = array<i64: 64, 48>}, {transform_indices = @transform_2, window_bounds = array<i64: 64, 128>}, {transform_indices = @transform_3, window_bounds = array<i64: 48, 128>}, {transform_indices = @transform_4, window_bounds = array<i64: 1, 128>}, {transform_indices = @transform_5, window_bounds = array<i64: 64, 128>}]} {
    %c0 = arith.constant 0 : index
    %c0_0 = arith.constant 0 : index
    %0 = vector.load %arg2[%c0, %c0_0] : memref<64x64xf32, #tpu.memory_space<vmem>>, vector<64x64xf32>
    %c0_1 = arith.constant 0 : index
    %c0_2 = arith.constant 0 : index
    %1 = vector.load %arg4[%c0_1, %c0_2] : memref<64x128xf32, #tpu.memory_space<vmem>>, vector<64x128xf32>
    %cst = arith.constant dense<0.000000e+00> : vector<64x128xf32>
    %2 = tpu.matmul %0, %1, %cst {dimension_numbers = #tpu.dot_dimension_numbers<[1], [0], [0], [1], [0, 0, 1, 1], [], []>} : vector<64x64xf32>, vector<64x128xf32>, vector<64x128xf32> -> vector<64x128xf32>
    %c0_3 = arith.constant 0 : index
    %c0_4 = arith.constant 0 : index
    %3 = vector.load %arg3[%c0_3, %c0_4] : memref<64x48xf32, #tpu.memory_space<vmem>>, vector<64x48xf32>
    %c0_5 = arith.constant 0 : index
    %c0_6 = arith.constant 0 : index
    %4 = vector.load %arg5[%c0_5, %c0_6] : memref<48x128xf32, #tpu.memory_space<vmem>>, vector<48x128xf32>
    %cst_7 = arith.constant dense<0.000000e+00> : vector<64x128xf32>
    %5 = tpu.matmul %3, %4, %cst_7 {dimension_numbers = #tpu.dot_dimension_numbers<[1], [0], [0], [1], [0, 0, 1, 1], [], []>} : vector<64x48xf32>, vector<48x128xf32>, vector<64x128xf32> -> vector<64x128xf32>
    %6 = arith.addf %2, %5 : vector<64x128xf32>
    %c0_8 = arith.constant 0 : index
    %c0_9 = arith.constant 0 : index
    %7 = vector.load %arg6[%c0_8, %c0_9] : memref<1x128xf32, #tpu.memory_space<vmem>>, vector<1x128xf32>
    %8 = vector.broadcast %7 : vector<1x128xf32> to vector<64x128xf32>
    %9 = arith.addf %6, %8 : vector<64x128xf32>
    %c0_10 = arith.constant 0 : index
    %c0_11 = arith.constant 0 : index
    %10 = vector.load %arg7[%c0_10, %c0_11] : memref<64x128xf32, #tpu.memory_space<vmem>>, vector<64x128xf32>
    tpu.vector_store %arg7[%c0_10, %c0_11], %9 {strides = array<i32>} : memref<64x128xf32, #tpu.memory_space<vmem>>, vector<64x128xf32>,
    return
  }
  func.func @transform_0(%arg0: i32, %arg1: i32) -> (i32, i32) {
    %c0_i32 = arith.constant 0 : i32
    %c0_i32_0 = arith.constant 0 : i32
    return %arg0, %c0_i32 : i32, i32
  }
  func.func @transform_1(%arg0: i32, %arg1: i32) -> (i32, i32) {
    %c0_i32 = arith.constant 0 : i32
    %c0_i32_0 = arith.constant 0 : i32
    return %arg0, %c0_i32 : i32, i32
  }
  func.func @transform_2(%arg0: i32, %arg1: i32) -> (i32, i32) {
    %c0_i32 = arith.constant 0 : i32
    %c0_i32_0 = arith.constant 0 : i32
    return %c0_i32, %arg1 : i32, i32
  }
  func.func @transform_3(%arg0: i32, %arg1: i32) -> (i32, i32) {
    %c0_i32 = arith.constant 0 : i32
    %c0_i32_0 = arith.constant 0 : i32
    return %c0_i32, %arg1 : i32, i32
  }
  func.func @transform_4(%arg0: i32, %arg1: i32) -> (i32, i32) {
    %c0_i32 = arith.constant 0 : i32
    %c0_i32_0 = arith.constant 0 : i32
    return %c0_i32, %arg1 : i32, i32
  }
  func.func @transform_5(%arg0: i32, %arg1: i32) -> (i32, i32) {
    %c0_i32 = arith.constant 0 : i32
    return %arg0, %arg1 : i32, i32
  }
}

</mosaic_0001>

<bundles_post_ra>
// kernel: patch_embed_forward.1
= control target key start
LH: loop header
LB: loop body
LE: loop exit
PB: predicated region body
PF: predicated region fallthrough
CT: control target
= control target key end

     0   :  { %vm51_vm0 = vcmask 392192   ;;  %s619_s0 = inlined_call_operand.vmem [shape: f32[64,64], index: 0, kind: input, shape index: {}]   ;;  %s620_s1 = inlined_call_operand.vmem [shape: f32[64,48], index: 1, kind: input, shape index: {}]   ;;  %s621_s2 = inlined_call_operand.vmem [shape: f32[64,128], index: 2, kind: input, shape index: {}]   ;;  %s622_s3 = inlined_call_operand.vmem [shape: f32[48,128], index: 3, kind: input, shape index: {}]   ;;  %s623_s4 = inlined_call_operand.vmem [shape: f32[1,128], index: 4, kind: input, shape index: {}]   ;;  %s624_s5 = inlined_call_operand.hbm [shape: f32[64,128], index: 5, kind: output, shape index: {}]  }
   0x1   :  { %v36_v0 = vld [vmem:[%s621_s2 + $0x38] sm:$0xff]  ;;  %v50_v1 = vld [vmem:[%s622_s3 + $0x28] sm:$0xff]  ;;  %v35_v2 = vld [vmem:[%s621_s2 + $0x30] sm:$0xff] }
   0x2   :  { %421 = vmatprep.subr.mxu1 %v36_v0  ;;  %397 = vmatprep.subr.mxu0 %v50_v1  ;;  %v49_v3 = vld [vmem:[%s622_s3 + $0x20] sm:$0xff]  ;;  %v34_v4 = vld [vmem:[%s621_s2 + $0x28] sm:$0xff]  ;;  %v48_v5 = vld [vmem:[%s622_s3 + $0x18] sm:$0xff] }
   0x3   :  { %422 = vmatpush3.msra.mxu1 %v36_v0  ;;  %398 = vmatpush3.msra.mxu0 %v50_v1  ;;  %v33_v6 = vld [vmem:[%s621_s2 + $0x20] sm:$0xff]  ;;  %v47_v7 = vld [vmem:[%s622_s3 + $0x10] sm:$0xff]  ;;  %v32_v8 = vld [vmem:[%s621_s2 + $0x18] sm:$0xff] }
   0x4   :  { %423 = vmatprep.subr.mxu1 %v35_v2  ;;  %399 = vmatprep.subr.mxu0 %v49_v3  ;;  %v46_v9 = vld [vmem:[%s622_s3 + $0x8] sm:$0xff]  ;;  %v31_v10 = vld [vmem:[%s621_s2 + $0x10] sm:$0xff]  ;;  %v45_v11 = vld [vmem:[%s622_s3] sm:$0xff] }
   0x5   :  { %424 = vmatpush3.msra.mxu1 %v35_v2  ;;  %400 = vmatpush3.msra.mxu0 %v49_v3  ;;  %v30_v12 = vld [vmem:[%s621_s2 + $0x8] sm:$0xff]  ;;  %v37_v13 = vld [vmem:[%s620_s1] sm:$0xff] }
   0x6   :  { %425 = vmatprep.subr.mxu1 %v34_v4  ;;  %401 = vmatprep.subr.mxu0 %v48_v5 }
   0x7   :  { %426 = vmatpush3.msra.mxu1 %v34_v4  ;;  %402 = vmatpush3.msra.mxu0 %v48_v5 }
   0x8   :  { %427 = vmatprep.subr.mxu1 %v33_v6  ;;  %403 = vmatprep.subr.mxu0 %v47_v7 }
   0x9   :  { %428 = vmatpush3.msra.mxu1 %v33_v6  ;;  %404 = vmatpush3.msra.mxu0 %v47_v7 }
   0xa   :  { %429 = vmatprep.subr.mxu1 %v32_v8  ;;  %405 = vmatprep.subr.mxu0 %v46_v9 }
   0xb   :  { %430 = vmatpush3.msra.mxu1 %v32_v8  ;;  %406 = vmatpush3.msra.mxu0 %v46_v9 }
   0xc   :  { %10 = vsyncpa [#allocation3], 0  ;;  %431 = vmatprep.subr.mxu1 %v31_v10  ;;  %407 = vmatprep.subr.mxu0 %v45_v11  ;;  %v38_v14 = vld [vmem:[%s620_s1 + $0x8] sm:$0xff]  ;;  %v29_v15 = vld [vmem:[%s621_s2] sm:$0xff]  ;;  %vm181_vm1 = vcmask 523264  }
   0xd   :  { %432 = vmatpush3.msra.mxu1 %v31_v10  ;;  %408 = vmatpush3.msra.mxu0 %v45_v11  ;;  %v21_v16 = vld [vmem:[%s619_s0] sm:$0xff]  ;;  %v39_v17 = vld [vmem:[%s620_s1 + $0x10] sm:$0xff]  ;;  %v22_v18 = vld [vmem:[%s619_s0 + $0x8] sm:$0xff] }
   0xe   :  { %433 = vmatprep.subr.mxu1 %v30_v12  ;;  %409 = vmatprep.mubr.msk.f32.mxu0 %vm51_vm0, %v37_v13  ;;  %v40_v19 = vld [vmem:[%s620_s1 + $0x18] sm:$0xff]  ;;  %v23_v20 = vld [vmem:[%s619_s0 + $0x10] sm:$0xff]  ;;  %v41_v21 = vld [vmem:[%s620_s1 + $0x20] sm:$0xff] }
   0xf   :  { %434 = vmatpush3.msra.mxu1 %v30_v12  ;;  %410 = vmatmul.mubr.msk.f32.vlgmr.msra.gmra.mxu0 %vm51_vm0, %v38_v14  ;;  %v24_v22 = vld [vmem:[%s619_s0 + $0x18] sm:$0xff]  ;;  %v42_v23 = vld [vmem:[%s620_s1 + $0x28] sm:$0xff]  ;;  %v25_v24 = vld [vmem:[%s619_s0 + $0x20] sm:$0xff] }
  0x10   :  { %435 = vmatprep.subr.mxu1 %v29_v15  ;;  %437 = vmatprep.mubr.msk.f32.mxu1 %vm181_vm1, %v21_v16  ;;  %v43_v25 = vld [vmem:[%s620_s1 + $0x30] sm:$0xff]  ;;  %v26_v26 = vld [vmem:[%s619_s0 + $0x28] sm:$0xff]  ;;  %v44_v27 = vld [vmem:[%s620_s1 + $0x38] sm:$0xff] }
  0x11   :  { %436 = vmatpush3.msra.mxu1 %v29_v15  ;;  %412 = vmatprep.mubr.msk.f32.mxu0 %vm51_vm0, %v39_v17  ;;  %v27_v28 = vld [vmem:[%s619_s0 + $0x30] sm:$0xff]  ;;  %v28_v29 = vld [vmem:[%s619_s0 + $0x38] sm:$0xff]  ;;  %v366_v33 = vld [vmem:[%s623_s4] ss:$0 sm:$0xff]  ;;  %s474_s0 = smov [#allocation2]  }
  0x12   :  { %438 = vmatmul.mubr.msk.f32.vlgmr.msra.gmra.mxu1 %vm181_vm1, %v22_v18  ;;  %s339_s4 = sshll.u32 %s474_s0, 4  ;;  %s340_s4 = int_to_ptr.vmem [resolvable:$true] %s339_s4 }
  0x13   :  { %413 = vmatmul.mubr.msk.f32.gmra.mxu0 %vm51_vm0, %v40_v19  ;;  %440 = vmatprep.mubr.msk.f32.mxu1 %vm181_vm1, %v23_v20  ;;  %s452_s26 = scalar_lea.vmem %s340_s4, 1024  ;;  %p457_p1 = scmp.lt.s32.totalorder %s340_s4, %s340_s4 }
  0x14   :  { %415 = vmatprep.mubr.msk.f32.mxu0 %vm51_vm0, %v41_v21  ;;  %p453_p0 = scmp.ne.s32.totalorder %s340_s4, %s452_s26  ;;  %p458_p2 = scmp.lt.s32.totalorder %s452_s26, %s452_s26 }
  0x16   :  { %441 = vmatmul.mubr.msk.f32.gmra.mxu1 %vm181_vm1, %v24_v22  ;;  %p459_p3 = por %p458_p2, %p457_p1 }
  0x17   :  { %416 = vmatmul.mubr.msk.f32.gmra.mxu0 %vm51_vm0, %v42_v23  ;;  %443 = vmatprep.mubr.msk.f32.mxu1 %vm181_vm1, %v25_v24 }
  0x18   :  { %418 = vmatprep.mubr.msk.f32.mxu0 %vm51_vm0, %v43_v25  ;;  %p460_p4 = pnand %p459_p3, %p453_p0 }
  0x1a   :  { %444 = vmatmul.mubr.msk.f32.gmra.mxu1 %vm181_vm1, %v26_v26 }
  0x1b   :  { %419 = vmatmul.mubr.msk.f32.gmra.mxu0 %vm51_vm0, %v44_v27  ;;  %446 = vmatprep.mubr.msk.f32.mxu1 %vm181_vm1, %v27_v28 }
  0x1e   :  { %447 = vmatmul.mubr.msk.f32.gmra.mxu1 %vm181_vm1, %v28_v29 }
  0xcf   :  { %v411_v30 = vpop.f32.mrf.mxu0 }
  0xd1   :  { %v142_v31 = vpop.f32.mrf.mxu0 }
  0xd2   :  { %v439_v32 = vpop.f32.mrf.mxu1 }
  0xd3   :  { %v278_v34 = vadd.f32 %v439_v32, %v411_v30  ;;  %v414_v35 = vpop.f32.mrf.mxu0 }
  0xd4   :  { %v272_v36 = vpop.f32.mrf.mxu1 }
  0xd5   :  { %v319_v37 = vadd.f32 %v366_v33, %v278_v34  ;;  %v273_v38 = vadd.f32 %v272_v36, %v142_v31  ;;  %v152_v39 = vpop.f32.mrf.mxu0 }
  0xd6   :  { %v442_v40 = vpop.f32.mrf.mxu1 }
  0xd7   :  { %327 = vst [vmem:[#allocation2 + $0x8] sm:$0xff] %v319_v37  ;;  %v318_v41 = vadd.f32 %v366_v33, %v273_v38  ;;  %v288_v42 = vadd.f32 %v442_v40, %v414_v35  ;;  %v417_v43 = vpop.f32.mrf.mxu0 }
  0xd8   :  { %v282_v44 = vpop.f32.mrf.mxu1 }
  0xd9   :  { %326 = vst [vmem:[#allocation2] sm:$0xff] %v318_v41  ;;  %v321_v45 = vadd.f32 %v366_v33, %v288_v42  ;;  %v283_v46 = vadd.f32 %v282_v44, %v152_v39  ;;  %v162_v47 = vpop.f32.mrf.mxu0 }
  0xda   :  { %v445_v48 = vpop.f32.mrf.mxu1 }
  0xdb   :  { %329 = vst [vmem:[#allocation2 + $0x18] sm:$0xff] %v321_v45  ;;  %v320_v49 = vadd.f32 %v366_v33, %v283_v46  ;;  %v298_v50 = vadd.f32 %v445_v48, %v417_v43  ;;  %v420_v51 = vpop.f32.mrf.mxu0 }
  0xdc   :  { %v292_v52 = vpop.f32.mrf.mxu1 }
  0xdd   :  { %328 = vst [vmem:[#allocation2 + $0x10] sm:$0xff] %v320_v49  ;;  %v323_v53 = vadd.f32 %v366_v33, %v298_v50  ;;  %v293_v54 = vadd.f32 %v292_v52, %v162_v47  ;;  %v172_v58 = vpop.f32.mrf.mxu0 }
  0xde   :  { %v448_v55 = vpop.f32.mrf.mxu1 }
  0xdf   :  { %331 = vst [vmem:[#allocation2 + $0x28] sm:$0xff] %v323_v53  ;;  %v322_v56 = vadd.f32 %v366_v33, %v293_v54  ;;  %v308_v57 = vadd.f32 %v448_v55, %v420_v51 }
  0xe0   :  { %v302_v59 = vpop.f32.mrf.mxu1 }
  0xe1   :  { %330 = vst [vmem:[#allocation2 + $0x20] sm:$0xff] %v322_v56  ;;  %v325_v60 = vadd.f32 %v366_v33, %v308_v57  ;;  %v303_v61 = vadd.f32 %v302_v59, %v172_v58 }
  0xe3   :  { %333 = vst [vmem:[#allocation2 + $0x38] sm:$0xff] %v325_v60  ;;  %v324_v62 = vadd.f32 %v366_v33, %v303_v61 }
  0xe5   :  { %332 = vst [vmem:[#allocation2 + $0x30] sm:$0xff] %v324_v62 }
  0xe6   :  { %463 = shalt.err (!%p460_p4)
}
  0xe7   :  { %s475_s27 = smov 128   ;;  %s476_s28 = smov 8  }
  0xe8   :  { %345 = dma.vmem_to_hbm [thread:$0]  %s340_s4, 1024, %s624_s5, [#allocation3], %s475_s27, %s475_s27, %s476_s28  }
  0xe9   :  { %472 = dma.done.wait [#allocation3], 1024  }
  0xea   :  { %473 = vsyncadd [#allocation3], 4294966272 }
  0xeb   :  { %349 = vsyncpa [#allocation3], 1 }

</bundles_post_ra>
